<compile_context>
chip_gen: v7x
topology: tpu7x:2x2x1
jax: 0.10.0
libtpu: 0.0.40
codegen_flags: <defaults>
</compile_context>

<pallas_src>
import jax
import jax.numpy as jnp
from jax.experimental import pallas as pl
from jax.experimental.pallas import tpu as pltpu


def _round_up(x, m):
    return ((x + m - 1) // m) * m


def _vmem_capacity_bytes():
    """Physical VMEM per TensorCore; falls back to the smallest (v7x) value."""
    try:
        return int(pltpu.get_tpu_info().vmem_capacity_bytes)
    except Exception:
        return 64 * 1024 * 1024


def _proj_kernel(x_ref, w_ref, b_ref, o_ref):
    """o = x @ w + b.

    Activations are cast to the (bf16) weight dtype for a single-pass MXU
    matmul; accumulation and the bias add stay in f32.
    """
    x = x_ref[...].astype(w_ref.dtype)
    acc = jnp.dot(x, w_ref[...], preferred_element_type=jnp.float32)
    o_ref[...] = (acc + b_ref[...].astype(jnp.float32)).astype(o_ref.dtype)


@jax.jit
def pallas_linear(x2d, w, b):
    """x2d: [N, H] activations, w: [H, P] (bf16), b: [1, P] (f32) -> [N, P]."""
    n, h = x2d.shape
    p = w.shape[1]
    x_bytes = jnp.dtype(x2d.dtype).itemsize
    w_bytes = jnp.dtype(w.dtype).itemsize
    o_bytes = x_bytes

    # Lane-dense output stores: pad only the small weight/bias along P to a
    # multiple of 128 when needed.  Activations are never padded or copied.
    p_pad = _round_up(p, 128)
    if p_pad != p:
        w = jnp.pad(w, ((0, 0), (0, p_pad - p)))
        b = jnp.pad(b, ((0, 0), (0, p_pad - p)))

    # VMEM budget: v7x has 64 MiB/TC, v5e/v6e 128 MiB.  Leave headroom for
    # Mosaic's internal scratch; tiles get half the scoped limit.
    cap = _vmem_capacity_bytes()
    vmem_limit = min((cap * 3) // 4, 96 * 1024 * 1024)
    budget = vmem_limit // 2

    collapse = p_pad <= 512           # whole weight fits one column tile
    tn = p_pad if collapse else 512   # column tile (multiple of 128)

    # Biggest row tile whose double-buffered working set fits the budget.
    fixed = 2 * (h * tn * w_bytes + tn * 4)       # weight + bias buffers
    per_row = 2 * (h * x_bytes + tn * o_bytes)    # x + out, double-buffered
    tm = (max(budget - fixed, 8 * per_row) // per_row) // 8 * 8
    tm = max(8, min(1024, tm))
    tm = min(tm, _round_up(n, 8))

    cost = pl.CostEstimate(
        flops=2 * n * h * p,
        transcendentals=0,
        bytes_accessed=x_bytes * n * h + w_bytes * h * p_pad + o_bytes * n * p_pad,
    )

    if collapse:
        # 1-D grid over row tiles: weights/bias VMEM-resident (fetched once),
        # activations streamed exactly once, row axis megacore-sharded on v7x.
        grid = (pl.cdiv(n, tm),)
        in_specs = [
            pl.BlockSpec((tm, h), lambda i: (i, 0)),        # activations
            pl.BlockSpec((h, p_pad), lambda i: (0, 0)),     # full weight, DMA'd once
            pl.BlockSpec((1, p_pad), lambda i: (0, 0)),     # full bias, DMA'd once
        ]
        out_specs = pl.BlockSpec((tm, p_pad), lambda i: (i, 0))
        dims = ("parallel",)
    else:
        # Wide-P fallback: rows on the leading (megacore) axis, column tiles
        # inner; the (tm, H) activation block is resident across the inner
        # column axis so the dominant [N, H] stream is still read only once.
        grid = (pl.cdiv(n, tm), pl.cdiv(p_pad, tn))
        in_specs = [
            pl.BlockSpec((tm, h), lambda i, j: (i, 0)),
            pl.BlockSpec((h, tn), lambda i, j: (0, j)),
            pl.BlockSpec((1, tn), lambda i, j: (0, j)),
        ]
        out_specs = pl.BlockSpec((tm, tn), lambda i, j: (i, j))
        dims = ("parallel", "parallel")

    out = pl.pallas_call(
        _proj_kernel,
        out_shape=jax.ShapeDtypeStruct((n, p_pad), x2d.dtype),
        grid_spec=pltpu.PrefetchScalarGridSpec(
            num_scalar_prefetch=0,
            grid=grid,
            in_specs=in_specs,
            out_specs=out_specs,
        ),
        compiler_params=pltpu.CompilerParams(
            dimension_semantics=dims,
            vmem_limit_bytes=vmem_limit,
        ),
        cost_estimate=cost,
    )(x2d, w, b)

    # Avoid the slice copy entirely when no column padding was applied.
    return out if p_pad == p else out[:, :p]


class SpanRepr:
    """JAX/Pallas port of the abstract SpanRepr base class."""

    def __init__(self, input_dim, use_proj=False, proj_dim=256, key=None):
        self.input_dim = input_dim
        self.proj_dim = proj_dim
        self.use_proj = use_proj
        if use_proj:
            if key is None:
                key = jax.random.PRNGKey(0)
            kw, kb = jax.random.split(key)
            # Mimics nn.Linear's init; weight kept transposed as [H, P] and in
            # bf16 for the single-pass MXU matmul; bias stays f32.
            bound = 1.0 / (input_dim ** 0.5)
            w_pt = jax.random.uniform(
                kw, (proj_dim, input_dim), jnp.float32, -bound, bound)
            b_pt = jax.random.uniform(
                kb, (proj_dim,), jnp.float32, -bound, bound)
            self.proj_w = jnp.transpose(w_pt).astype(jnp.bfloat16)  # [H, P]
            self.proj_b = b_pt.reshape(1, proj_dim)                 # [1, P] f32

    def project(self, encoded_input):
        """Apply the concrete part of SpanRepr: optional Linear projection."""
        if not self.use_proj:
            return encoded_input
        b, t, h = encoded_input.shape
        # Contiguous reshape -> view, no HBM copy.
        x2d = encoded_input.reshape(b * t, h)
        y2d = pallas_linear(x2d, self.proj_w, self.proj_b)
        return y2d.reshape(b, t, self.proj_dim)

    def forward(self, encoded_input, start_ids, end_ids):
        # TODO(synk): abstract in PyTorch (raises NotImplementedError); the only
        # defined computation is the projection, which we run here.
        del start_ids, end_ids
        return self.project(encoded_input)

    def get_input_dim(self):
        return self.input_dim

    def get_output_dim(self):
        return self.proj_dim if self.use_proj else self.input_dim


def _reference_project(encoded_input, w_hp, b_1p):
    """Pure-JAX reference with the same bf16-operand / f32-accumulate math."""
    xb = encoded_input.astype(w_hp.dtype)
    y = jnp.einsum("bth,hp->btp", xb, w_hp,
                   preferred_element_type=jnp.float32)
    return (y + b_1p.astype(jnp.float32)[None]).astype(encoded_input.dtype)


if __name__ == "__main__":
    key = jax.random.PRNGKey(0)
    k_x, k_params = jax.random.split(key)

    batch, seq, hidden, proj_dim = 2, 8, 32, 64
    encoded_input = jax.random.normal(k_x, (batch, seq, hidden), jnp.float32)
    start_ids = jnp.array([[0, 2], [1, 3]], dtype=jnp.int32)
    end_ids = jnp.array([[4, 6], [5, 7]], dtype=jnp.int32)

    module = SpanRepr(hidden, use_proj=True, proj_dim=proj_dim, key=k_params)
    out = jax.block_until_ready(module.forward(encoded_input, start_ids, end_ids))

    ref = _reference_project(encoded_input, module.proj_w, module.proj_b)
    assert out.shape == (batch, seq, proj_dim)
    assert jnp.allclose(out, ref, atol=1e-3, rtol=1e-3)

    print("KERNEL_OK")
</pallas_src>

<mosaic_0001>
module attributes {stable_mosaic.version = 11 : i64} {
  func.func @_proj_kernel(%arg0: i32, %arg1: memref<16x32xf32, #tpu.memory_space<vmem>>, %arg2: memref<32x128xbf16, #tpu.memory_space<vmem>>, %arg3: memref<1x128xf32, #tpu.memory_space<vmem>>, %arg4: memref<16x128xf32, #tpu.memory_space<vmem>>) attributes {dimension_semantics = [#tpu.dimension_semantics<parallel>], iteration_bounds = array<i64: 1>, scalar_prefetch = 0 : i64, scratch_operands = 0 : i64, tpu.core_type = #tpu.core_type<tc>, window_params = [{transform_indices = @transform_0, window_bounds = array<i64: 16, 32>}, {pipeline_mode = #tpu.pipeline_mode<synchronous>, transform_indices = @transform_1, window_bounds = array<i64: 32, 128>}, {pipeline_mode = #tpu.pipeline_mode<synchronous>, transform_indices = @transform_2, window_bounds = array<i64: 1, 128>}, {transform_indices = @transform_3, window_bounds = array<i64: 16, 128>}]} {
    %c0 = arith.constant 0 : index
    %c0_0 = arith.constant 0 : index
    %0 = vector.load %arg1[%c0, %c0_0] : memref<16x32xf32, #tpu.memory_space<vmem>>, vector<16x32xf32>
    %1 = arith.truncf %0 : vector<16x32xf32> to vector<16x32xbf16>
    %c0_1 = arith.constant 0 : index
    %c0_2 = arith.constant 0 : index
    %2 = vector.load %arg2[%c0_1, %c0_2] : memref<32x128xbf16, #tpu.memory_space<vmem>>, vector<32x128xbf16>
    %cst = arith.constant dense<0.000000e+00> : vector<16x128xf32>
    %3 = tpu.matmul %1, %2, %cst {dimension_numbers = #tpu.dot_dimension_numbers<[1], [0], [0], [1], [0, 0, 1, 1], [], []>} : vector<16x32xbf16>, vector<32x128xbf16>, vector<16x128xf32> -> vector<16x128xf32>
    %c0_3 = arith.constant 0 : index
    %c0_4 = arith.constant 0 : index
    %4 = vector.load %arg3[%c0_3, %c0_4] : memref<1x128xf32, #tpu.memory_space<vmem>>, vector<1x128xf32>
    %5 = vector.broadcast %4 : vector<1x128xf32> to vector<16x128xf32>
    %6 = arith.addf %3, %5 : vector<16x128xf32>
    %c0_5 = arith.constant 0 : index
    %c0_6 = arith.constant 0 : index
    %7 = vector.load %arg4[%c0_5, %c0_6] : memref<16x128xf32, #tpu.memory_space<vmem>>, vector<16x128xf32>
    tpu.vector_store %arg4[%c0_5, %c0_6], %6 {strides = array<i32>} : memref<16x128xf32, #tpu.memory_space<vmem>>, vector<16x128xf32>,
    return
  }
  func.func @transform_0(%arg0: i32) -> (i32, i32) {
    %c0_i32 = arith.constant 0 : i32
    %c0_i32_0 = arith.constant 0 : i32
    return %arg0, %c0_i32 : i32, i32
  }
  func.func @transform_1(%arg0: i32) -> (i32, i32) {
    %c0_i32 = arith.constant 0 : i32
    %c0_i32_0 = arith.constant 0 : i32
    %c0_i32_1 = arith.constant 0 : i32
    return %c0_i32, %c0_i32_0 : i32, i32
  }
  func.func @transform_2(%arg0: i32) -> (i32, i32) {
    %c0_i32 = arith.constant 0 : i32
    %c0_i32_0 = arith.constant 0 : i32
    %c0_i32_1 = arith.constant 0 : i32
    return %c0_i32, %c0_i32_0 : i32, i32
  }
  func.func @transform_3(%arg0: i32) -> (i32, i32) {
    %c0_i32 = arith.constant 0 : i32
    %c0_i32_0 = arith.constant 0 : i32
    return %arg0, %c0_i32 : i32, i32
  }
}

</mosaic_0001>

<bundles_post_ra>
// kernel: pallas_linear.1
= control target key start
LH: loop header
LB: loop body
LE: loop exit
PB: predicated region body
PF: predicated region fallthrough
CT: control target
= control target key end

     0   :  { %v151_v1 = vmov 0.0   ;;  %vm152_vm0 = vmmov 0   ;;  %s203_s0 = inlined_call_operand.vmem [shape: f32[16,32], index: 0, kind: input, shape index: {}]   ;;  %s204_s1 = inlined_call_operand.vmem [shape: bf16[32,128], index: 1, kind: input, shape index: {}]   ;;  %s205_s2 = inlined_call_operand.vmem [shape: f32[1,128], index: 2, kind: input, shape index: {}]   ;;  %s206_s3 = inlined_call_operand.hbm [shape: f32[16,128], index: 3, kind: output, shape index: {}]  }
   0x1   :  { %v125_v0 = vld [vmem:[%s204_s1] sm:$0xff]   ;;  %112 = vmatprep.subr.bf16.mxu0 %v151_v1  ;;  %v126_v2 = vld [vmem:[%s204_s1 + $0x8] sm:$0xff]   ;;  %116 = vmatprep.mubr.msk.bf16.mxu0 %vm152_vm0, %v151_v1 }
   0x2   :  { %113 = vmatpush3.bf16.msra.mxu0 %v125_v0  ;;  %v16_v3 = vld [vmem:[%s203_s0] sm:$0xff]  ;;  %v17_v4 = vld [vmem:[%s203_s0 + $0x8] sm:$0xff] }
   0x3   :  { %114 = vmatprep.subr.bf16.mxu0 %v151_v1 }
   0x4   :  { %8 = vsyncpa [#allocation3], 0  ;;  %v18_v5 = vpack.c.bf16 %v17_v4, %v16_v3  ;;  %vm42_vm1 = vcmask 261120   ;;  %v105_v6 = vld [vmem:[%s205_s2] ss:$0 sm:$0xff]  ;;  %s153_s1 = smov [#allocation2]  }
   0x5   :  { %s94_s22 = sshll.u32 %s153_s1, 4  ;;  %s95_s22 = int_to_ptr.vmem [resolvable:$true] %s94_s22 }
   0x6   :  { %115 = vmatpush3.bf16.msra.mxu0 %v126_v2  ;;  %s127_s0 = scalar_lea.vmem %s95_s22, 256  ;;  %p132_p1 = scmp.lt.s32.totalorder %s95_s22, %s95_s22 }
   0x7   :  { %p128_p0 = scmp.ne.s32.totalorder %s95_s22, %s127_s0  ;;  %p133_p2 = scmp.lt.s32.totalorder %s127_s0, %s127_s0 }
   0x9   :  { %117 = vmatmul.mubr.msk.bf16.vlgmr.msra.gmra.mrb[0].mxu0 %vm42_vm1, %v18_v5  ;;  %p134_p3 = por %p133_p2, %p132_p1 }
   0xb   :  { %p135_p4 = pnand %p134_p3, %p128_p0 }
  0xdc   :  { %v80_v7 = vpop.f32.mrb[0].mxu0 }
  0xdd   :  { %v81_v8 = vadd.f32 %v105_v6, %v80_v7  ;;  %v118_v9 = vpop.f32.mrb[1].mxu0 }
  0xde   :  { %v83_v10 = vpop.f32.mrb[2].mxu0 }
  0xdf   :  { %87 = vst [vmem:[#allocation2] sm:$0xff] %v81_v8  ;;  %v84_v11 = vadd.f32 %v105_v6, %v83_v10  ;;  %v119_v12 = vpop.f32.mrb[3].mxu0 }
  0xe1   :  { %88 = vst [vmem:[#allocation2 + $0x8] sm:$0xff] %v84_v11 }
  0xe2   :  { %138 = shalt.err (!%p135_p4)
}
  0xe3   :  { %s139_s24 = scalar_lea.hbm %s206_s3, 256 }
  0xe4   :  { %p140_p5 = scmp.ne.s32.totalorder %s206_s3, %s139_s24  ;;  %p143_p6 = scmp.lt.u32.totalorder %s139_s24, %s206_s3 }
  0xe6   :  { %p145_p7 = pnand %p143_p6, %p140_p5 }
  0xe8   :  { %148 = shalt.err (!%p145_p7)
}
  0xe9   :  { %s154_s29 = smov 128   ;;  %s155_s30 = smov 8  }
  0xea   :  { %100 = dma.vmem_to_hbm [thread:$0]  %s95_s22, 256, %s206_s3, [#allocation3], %s154_s29, %s154_s29, %s155_s30  }
  0xeb   :  { %149 = dma.done.wait [#allocation3], 256  }
  0xec   :  { %150 = vsyncadd [#allocation3], 4294967040 }
  0xed   :  { %104 = vsyncpa [#allocation3], 1 }

</bundles_post_ra>
